<compile_context>
chip_gen: v7x
topology: tpu7x:2x2x1
jax: 0.10.0
libtpu: 0.0.40
codegen_flags: <defaults>
</compile_context>

<pallas_src>
import jax
import jax.numpy as jnp
from jax import lax
from jax.experimental import pallas as pl
from jax.experimental.pallas import tpu as pltpu

C_IN = 768               # fixed by nn.Linear(768, 1) in the module
DEFAULT_TILE_T = 1024    # 1024*768*4 B = 3 MiB per f32 input buffer
LANE_SPLIT_MIN_T = 4096  # only split C across cores when T is large enough


def _make_kernel(T, tile_t, tile_c, needs_mask):
    """Build the streaming column-sum kernel for static (T, tile_t, tile_c)."""
    use_sublane_acc = (tile_t % 8 == 0) and (tile_t > 8)

    def kernel(x_ref, o_ref, acc_ref):
        t = pl.program_id(1)

        @pl.when(t == 0)
        def _init():
            acc_ref[...] = jnp.zeros_like(acc_ref)

        # Cast in-kernel (input stays in its native dtype in HBM).
        x = x_ref[...].astype(jnp.float32)

        if needs_mask:
            # Zero out rows of the (padded) last tile that lie beyond T.
            row = t * tile_t + lax.broadcasted_iota(jnp.int32, x.shape, 0)
            x = jnp.where(row < T, x, 0.0)

        if use_sublane_acc:
            # VPU-friendly partial reduce: keep 8 sublanes live, defer the
            # cross-sublane XLU reduce to the finalize step.
            acc_ref[...] += x.reshape(tile_t // 8, 8, tile_c).sum(axis=0)
        elif tile_t == 8:
            acc_ref[...] += x
        else:
            acc_ref[...] += jnp.sum(x, axis=0, keepdims=True)

        @pl.when(t == pl.num_programs(1) - 1)
        def _finalize():
            o_ref[...] = jnp.sum(acc_ref[...], axis=0, keepdims=True)

    acc_rows = 8 if (use_sublane_acc or tile_t == 8) else 1
    return kernel, acc_rows


def phoneme_attention(x, weight=None, bias=None, *, tile_t=DEFAULT_TILE_T):
    """x: (T, 768) float; weight: (1, 768); bias: (1,)  ->  (768,) f32.

    weight/bias are accepted for interface parity with the PyTorch module but
    have no effect on the output (softmax over the size-1 dim is exactly 1).
    """
    del weight, bias  # provably dead: softmax(dim=1) of a (T, 1) tensor == 1.0
    T, C = x.shape
    assert C == C_IN, f"expected C={C_IN}, got {C}"

    # Tile selection along T.
    if T <= tile_t:
        tile_t = T                       # single full-extent T block (always legal)
    grid_t = pl.cdiv(T, tile_t)
    needs_mask = (T % tile_t) != 0

    # Lane split (2 x 384) only pays off on multi-TC chips with long sequences.
    tile_c = 384 if T >= LANE_SPLIT_MIN_T else C
    grid_c = C // tile_c

    kernel, acc_rows = _make_kernel(T, tile_t, tile_c, needs_mask)

    out = pl.pallas_call(
        kernel,
        out_shape=jax.ShapeDtypeStruct((1, C), jnp.float32),
        grid_spec=pltpu.PrefetchScalarGridSpec(
            num_scalar_prefetch=0,
            grid=(grid_c, grid_t),
            in_specs=[pl.BlockSpec((tile_t, tile_c), lambda c, t: (t, c))],
            out_specs=pl.BlockSpec((1, tile_c), lambda c, t: (0, c)),
            scratch_shapes=[pltpu.VMEM((acc_rows, tile_c), jnp.float32)],
        ),
        compiler_params=pltpu.CompilerParams(
            dimension_semantics=("parallel", "arbitrary")),
    )(x)
    return out.reshape(C)


def _reference(x, weight, bias):
    x32 = x.astype(jnp.float32)
    logits = x32 @ weight.T + bias            # (T, 1)
    attn = jax.nn.softmax(logits, axis=1)     # exactly ones
    return (x32 * attn).sum(axis=0)           # (C,)


if __name__ == "__main__":
    key = jax.random.PRNGKey(0)
    k_x, k_w, k_b = jax.random.split(key, 3)

    T = 8
    x = jax.random.normal(k_x, (T, C_IN), dtype=jnp.float32)

    # Deterministic nn.Linear(768, 1)-style init: U(-1/sqrt(768), 1/sqrt(768))
    bound = 1.0 / (C_IN ** 0.5)
    weight = jax.random.uniform(k_w, (1, C_IN), jnp.float32, -bound, bound)
    bias = jax.random.uniform(k_b, (1,), jnp.float32, -bound, bound)

    out = phoneme_attention(x, weight, bias)
    out = jax.block_until_ready(out)

    ref = _reference(x, weight, bias)
    assert out.shape == (C_IN,)
    assert jnp.allclose(out, ref, atol=1e-4, rtol=1e-4), "mismatch vs reference"

    print("KERNEL_OK")
</pallas_src>

<mosaic_0001>
module attributes {stable_mosaic.version = 11 : i64} {
  func.func @kernel(%arg0: i32, %arg1: i32, %arg2: memref<8x768xf32, #tpu.memory_space<vmem>>, %arg3: memref<1x768xf32, #tpu.memory_space<vmem>>, %arg4: memref<8x768xf32, #tpu.memory_space<vmem>>) attributes {dimension_semantics = [#tpu.dimension_semantics<parallel>, #tpu.dimension_semantics<arbitrary>], iteration_bounds = array<i64: 1, 1>, scalar_prefetch = 0 : i64, scratch_operands = 1 : i64, tpu.core_type = #tpu.core_type<tc>, window_params = [{transform_indices = @transform_0, window_bounds = array<i64: 8, 768>}, {transform_indices = @transform_1, window_bounds = array<i64: 1, 768>}]} {
    %c0_i32 = arith.constant 0 : i32
    %0 = arith.cmpi eq, %arg1, %c0_i32 : i32
    %1 = arith.extui %0 : i1 to i32
    %c0_i32_0 = arith.constant 0 : i32
    %2 = arith.cmpi ne, %1, %c0_i32_0 : i32
    scf.if %2 {
      %cst = arith.constant 0.000000e+00 : f32
      %10 = vector.broadcast %cst : f32 to vector<8x768xf32>
      %c0_8 = arith.constant 0 : index
      %c0_9 = arith.constant 0 : index
      %11 = vector.load %arg4[%c0_8, %c0_9] : memref<8x768xf32, #tpu.memory_space<vmem>>, vector<8x768xf32>
      tpu.vector_store %arg4[%c0_8, %c0_9], %10 {strides = array<i32>} : memref<8x768xf32, #tpu.memory_space<vmem>>, vector<8x768xf32>,
    } else {
    }
    %c0 = arith.constant 0 : index
    %c0_1 = arith.constant 0 : index
    %3 = vector.load %arg2[%c0, %c0_1] : memref<8x768xf32, #tpu.memory_space<vmem>>, vector<8x768xf32>
    %c0_2 = arith.constant 0 : index
    %c0_3 = arith.constant 0 : index
    %4 = vector.load %arg4[%c0_2, %c0_3] : memref<8x768xf32, #tpu.memory_space<vmem>>, vector<8x768xf32>
    %5 = arith.addf %4, %3 : vector<8x768xf32>
    %c0_4 = arith.constant 0 : index
    %c0_5 = arith.constant 0 : index
    %6 = vector.load %arg4[%c0_4, %c0_5] : memref<8x768xf32, #tpu.memory_space<vmem>>, vector<8x768xf32>
    tpu.vector_store %arg4[%c0_4, %c0_5], %5 {strides = array<i32>} : memref<8x768xf32, #tpu.memory_space<vmem>>, vector<8x768xf32>,
    %c0_i32_6 = arith.constant 0 : i32
    %7 = arith.cmpi eq, %arg1, %c0_i32_6 : i32
    %8 = arith.extui %7 : i1 to i32
    %c0_i32_7 = arith.constant 0 : i32
    %9 = arith.cmpi ne, %8, %c0_i32_7 : i32
    scf.if %9 {
      %c0_8 = arith.constant 0 : index
      %c0_9 = arith.constant 0 : index
      %10 = vector.load %arg4[%c0_8, %c0_9] : memref<8x768xf32, #tpu.memory_space<vmem>>, vector<8x768xf32>
      %cst = arith.constant dense<0.000000e+00> : vector<768xf32>
      %11 = vector.multi_reduction <add>, %10, %cst [0] : vector<8x768xf32> to vector<768xf32>
      %12 = vector.shape_cast %11 : vector<768xf32> to vector<1x768xf32>
      %c0_10 = arith.constant 0 : index
      %c0_11 = arith.constant 0 : index
      %13 = vector.load %arg3[%c0_10, %c0_11] : memref<1x768xf32, #tpu.memory_space<vmem>>, vector<1x768xf32>
      tpu.vector_store %arg3[%c0_10, %c0_11], %12 {strides = array<i32>} : memref<1x768xf32, #tpu.memory_space<vmem>>, vector<1x768xf32>,
    } else {
    }
    return
  }
  func.func @transform_0(%arg0: i32, %arg1: i32) -> (i32, i32) {
    %c0_i32 = arith.constant 0 : i32
    return %arg1, %arg0 : i32, i32
  }
  func.func @transform_1(%arg0: i32, %arg1: i32) -> (i32, i32) {
    %c0_i32 = arith.constant 0 : i32
    %c0_i32_0 = arith.constant 0 : i32
    return %c0_i32, %arg0 : i32, i32
  }
}

</mosaic_0001>

<bundles_post_ra>
// kernel: tpu_custom_call.1
= control target key start
LH: loop header
LB: loop body
LE: loop exit
PB: predicated region body
PF: predicated region fallthrough
CT: control target
= control target key end

     0   :  { %6 = vsyncpa [#allocation4], 0  ;;  %s255_s0 = inlined_call_operand.hbm [shape: f32[8,768], index: 0, kind: input, shape index: {}]   ;;  %s256_s1 = inlined_call_operand.hbm [shape: f32[1,768], index: 1, kind: output, shape index: {}]  }
   0x1   :  { %7 = vsyncpa [#allocation5], 0  ;;  %s218_s6 = smov [#allocation3]   ;;  %s170_s10 = scalar_lea.hbm %s255_s0, 768 }
   0x2   :  { %s14_s7 = sshll.u32 %s218_s6, 4  ;;  %p171_p0 = scmp.ne.s32.totalorder %s255_s0, %s170_s10  ;;  %s15_s7 = int_to_ptr.vmem [resolvable:$true] %s14_s7 }
   0x3   :  { %p174_p1 = scmp.lt.u32.totalorder %s170_s10, %s255_s0 }
   0x5   :  { %p176_p2 = pnand %p174_p1, %p171_p0 }
   0x7   :  { %179 = shalt.err (!%p176_p2)
}
   0x8   :  { %s180_s15 = scalar_lea.vmem %s15_s7, 768  ;;  %p185_p4 = scmp.lt.s32.totalorder %s15_s7, %s15_s7 }
   0x9   :  { %p181_p3 = scmp.ne.s32.totalorder %s15_s7, %s180_s15  ;;  %p186_p5 = scmp.lt.s32.totalorder %s180_s15, %s180_s15 }
   0xb   :  { %p187_p6 = por %p186_p5, %p185_p4 }
   0xd   :  { %p188_p7 = pnand %p187_p6, %p181_p3 }
   0xf   :  { %191 = shalt.err (!%p188_p7)
}
  0x10   :  { %17 = dma.hbm_to_vmem [thread:$0]  %s255_s0, 768, %s15_s7, [#allocation4]  }
  0x11   :  { %214 = dma.done.wait [#allocation4], 768  }
  0x12   :  { %215 = vsyncadd [#allocation4], 4294966528  ;;  %v31_v0 = vld [vmem:[#allocation3] sm:$0xff]  ;;  %v32_v1 = vld [vmem:[#allocation3 + $0x8] sm:$0xff]  ;;  %v112_v12 = vlaneseq  ;;  %v219_v16 = vmov 1966171168  }
  0x13   :  { %v33_v2 = vld [vmem:[#allocation3 + $0x10] sm:$0xff]  ;;  %v34_v3 = vld [vmem:[#allocation3 + $0x18] sm:$0xff]  ;;  %v35_v4 = vld [vmem:[#allocation3 + $0x20] sm:$0xff]  ;;  %v64_v6 = vrot.slane %v31_v0, 4  ;;  %v70_v7 = vrot.slane %v32_v1, 4  ;;  %v110_v17 = vunpack.c.l.s4 %v219_v16  ;;  %s220_s0 = smov [#allocation6]  }
  0x14   :  { %v36_v5 = vld [vmem:[#allocation3 + $0x28] sm:$0xff]  ;;  %v76_v8 = vrot.slane %v33_v2, 4  ;;  %v82_v9 = vrot.slane %v34_v3, 4  ;;  %v88_v10 = vrot.slane %v35_v4, 4  ;;  %v113_v27 = vshrl.u32 %v112_v12, 7  ;;  %s158_s18 = sshll.u32 %s220_s0, 4  ;;  %s159_s18 = int_to_ptr.vmem [resolvable:$true] %s158_s18 }
  0x15   :  { %v94_v11 = vrot.slane %v36_v5, 4  ;;  %v65_v13 = vadd.f32 %v64_v6, %v31_v0  ;;  %v71_v14 = vadd.f32 %v70_v7, %v32_v1  ;;  %v111_v31 = vunpack.c.0.s8 %v110_v17  ;;  %s192_s19 = scalar_lea.vmem %s159_s18, 96  ;;  %p197_p9 = scmp.lt.s32.totalorder %s159_s18, %s159_s18 }
  0x16   :  { %v77_v15 = vadd.f32 %v76_v8, %v33_v2  ;;  %v83_v18 = vadd.f32 %v82_v9, %v34_v3  ;;  %v89_v19 = vadd.f32 %v88_v10, %v35_v4  ;;  %vm149_vm0 = vcmp.lt.s32.totalorder %v112_v12, 768  ;;  %p193_p8 = scmp.ne.s32.totalorder %s159_s18, %s192_s19  ;;  %p198_p10 = scmp.lt.s32.totalorder %s192_s19, %s192_s19 }
  0x17   :  { %v95_v20 = vadd.f32 %v94_v11, %v36_v5  ;;  %v66_v21 = vrot.slane %v65_v13, 2  ;;  %v72_v22 = vrot.slane %v71_v14, 2  ;;  %v114_v44 = vsub.s32 %v111_v31, %v113_v27 }
  0x18   :  { %v78_v23 = vrot.slane %v77_v15, 2  ;;  %v84_v24 = vrot.slane %v83_v18, 2  ;;  %v90_v25 = vrot.slane %v89_v19, 2  ;;  %p199_p11 = por %p198_p10, %p197_p9 }
  0x19   :  { %v96_v26 = vrot.slane %v95_v20, 2  ;;  %v67_v28 = vadd.f32 %v66_v21, %v65_v13  ;;  %v73_v29 = vadd.f32 %v72_v22, %v71_v14 }
  0x1a   :  { %v79_v30 = vadd.f32 %v78_v23, %v77_v15  ;;  %v85_v32 = vadd.f32 %v84_v24, %v83_v18  ;;  %v91_v33 = vadd.f32 %v90_v25, %v89_v19  ;;  %p200_p12 = pnand %p199_p11, %p193_p8 }
  0x1b   :  { %v97_v34 = vadd.f32 %v96_v26, %v95_v20  ;;  %v68_v35 = vrot.slane %v67_v28, 1  ;;  %v74_v36 = vrot.slane %v73_v29, 1 }
  0x1c   :  { %v80_v37 = vrot.slane %v79_v30, 1  ;;  %v86_v38 = vrot.slane %v85_v32, 1  ;;  %v92_v39 = vrot.slane %v91_v33, 1 }
  0x1d   :  { %v98_v40 = vrot.slane %v97_v34, 1  ;;  %v69_v41 = vadd.f32 %v68_v35, %v67_v28  ;;  %v75_v42 = vadd.f32 %v74_v36, %v73_v29 }
  0x1e   :  { %v81_v43 = vadd.f32 %v80_v37, %v79_v30  ;;  %v87_v45 = vadd.f32 %v86_v38, %v85_v32  ;;  %v93_v46 = vadd.f32 %v92_v39, %v91_v33 }
  0x1f   :  { %v99_v47 = vadd.f32 %v98_v40, %v97_v34  ;;  %v106_v48 = vcombine.low %v69_v41, %v75_v42 }
  0x20   :  { %v107_v49 = vcombine.low %v81_v43, %v87_v45 }
  0x21   :  { %v108_v50 = vcombine.low %v93_v46, %v99_v47  ;;  %v115_v51 = vrot.slane %v106_v48, %v114_v44 }
  0x22   :  { %v122_v52 = vrot.slane %v107_v49, %v114_v44 }
  0x23   :  { %v129_v53 = vrot.slane %v108_v50, %v114_v44 }
  0x24   :  { %v130_v54 = vcombine.low %v115_v51, %v122_v52 }
  0x25   :  { %v144_v55 = vrot.slane %v129_v53, %v114_v44 }
  0x26   :  { %v137_v56 = vrot.slane %v130_v54, %v114_v44 }
  0x28   :  { %v145_v57 = vcombine.low %v137_v56, %v144_v55 }
  0x2a   :  { %151 = vst.msk [vmem:[#allocation6] sm:$0x3f] %vm149_vm0, %v145_v57 }
  0x2b   :  { %203 = shalt.err (!%p200_p12)
}
  0x2c   :  { %s204_s22 = scalar_lea.hbm %s256_s1, 96 }
  0x2d   :  { %p205_p13 = scmp.ne.s32.totalorder %s256_s1, %s204_s22  ;;  %p208_p0 = scmp.lt.u32.totalorder %s204_s22, %s256_s1 }
  0x2f   :  { %p210_p1 = pnand %p208_p0, %p205_p13 }
  0x31   :  { %213 = shalt.err (!%p210_p1)
}
  0x32   :  { %161 = dma.vmem_to_hbm [thread:$0]  %s159_s18, 96, %s256_s1, [#allocation5]  }
  0x33   :  { %216 = dma.done.wait [#allocation5], 96  }
  0x34   :  { %217 = vsyncadd [#allocation5], 4294967200 }
  0x35   :  { %165 = vsyncpa [#allocation4], 1 }
  0x36   :  { %166 = vsyncpa [#allocation5], 1 }

</bundles_post_ra>
